<compile_context>
chip_gen: v6e
topology: v6e:2x2x1
jax: 0.10.0
libtpu: 0.0.40
codegen_flags: <defaults>
</compile_context>

<pallas_src>
import math

import jax
import jax.numpy as jnp
from jax.experimental import pallas as pl
from jax.experimental.pallas import tpu as pltpu


def _copy_kernel(x_ref, o_ref):
    # Single lane-dense, sublane-dense tile copy.
    o_ref[...] = x_ref[...]


def _largest_divisor_tile(dim, unit, limit):
    """Largest multiple of `unit` that divides `dim` and is <= `limit`.

    Falls back to the full extent when `dim` is not a multiple of `unit`
    (full-extent blocks are always legal on TPU)."""
    if dim % unit != 0:
        return dim
    t = min(dim, max(unit, (limit // unit) * unit))
    while dim % t != 0:
        t -= unit
    return t


def flatten(x):
    """Pallas equivalent of torch Flatten: (B, ...) -> (B, prod(rest))."""
    B = x.shape[0]
    N = int(math.prod(x.shape[1:]))

    # Metadata-only flatten of a contiguous row-major array: identical element
    # order to torch's x.view(x.size(0), -1), same dtype.
    x2 = jnp.reshape(x, (B, N))

    itemsize = jnp.dtype(x.dtype).itemsize
    # Sublane tile: multiple of 8 rows (capped at 64) when possible, else full B.
    tb = _largest_divisor_tile(B, 8, 64)
    # Lane tile: multiple of 128, targeting ~1 MiB per block, else full N.
    target_n = max(128, (1 << 20) // max(1, tb * itemsize))
    tn = _largest_divisor_tile(N, 128, target_n)

    grid = (B // tb, N // tn)

    return pl.pallas_call(
        _copy_kernel,
        out_shape=jax.ShapeDtypeStruct((B, N), x.dtype),
        grid=grid,
        in_specs=[pl.BlockSpec((tb, tn), lambda i, j: (i, j))],
        out_specs=pl.BlockSpec((tb, tn), lambda i, j: (i, j)),
        compiler_params=pltpu.CompilerParams(
            dimension_semantics=("parallel", "parallel")),
    )(x2)


if __name__ == "__main__":
    key = jax.random.PRNGKey(0)
    B, C, H, W = 2, 4, 16, 16
    x = jax.random.normal(key, (B, C, H, W), dtype=jnp.float32)

    y = flatten(x)
    y = jax.block_until_ready(y)

    assert y.shape == (B, C * H * W), y.shape
    ref = x.reshape(B, -1)  # row-major reshape == torch .view semantics
    assert jnp.array_equal(y, ref), "flatten kernel mismatch vs reference"

    print("KERNEL_OK")
</pallas_src>

<mosaic_0001>
module attributes {stable_mosaic.version = 11 : i64} {
  func.func @_copy_kernel(%arg0: i32, %arg1: i32, %arg2: memref<2x1024xf32, #tpu.memory_space<vmem>>, %arg3: memref<2x1024xf32, #tpu.memory_space<vmem>>) attributes {dimension_semantics = [#tpu.dimension_semantics<parallel>, #tpu.dimension_semantics<parallel>], iteration_bounds = array<i64: 1, 1>, scalar_prefetch = 0 : i64, scratch_operands = 0 : i64, tpu.core_type = #tpu.core_type<tc>, window_params = [{transform_indices = @transform_0, window_bounds = array<i64: 2, 1024>}, {transform_indices = @transform_1, window_bounds = array<i64: 2, 1024>}]} {
    %c0 = arith.constant 0 : index
    %c0_0 = arith.constant 0 : index
    %0 = vector.load %arg2[%c0, %c0_0] : memref<2x1024xf32, #tpu.memory_space<vmem>>, vector<2x1024xf32>
    %c0_1 = arith.constant 0 : index
    %c0_2 = arith.constant 0 : index
    %1 = vector.load %arg3[%c0_1, %c0_2] : memref<2x1024xf32, #tpu.memory_space<vmem>>, vector<2x1024xf32>
    tpu.vector_store %arg3[%c0_1, %c0_2], %0 {strides = array<i32>} : memref<2x1024xf32, #tpu.memory_space<vmem>>, vector<2x1024xf32>,
    return
  }
  func.func @transform_0(%arg0: i32, %arg1: i32) -> (i32, i32) {
    %c0_i32 = arith.constant 0 : i32
    return %arg0, %arg1 : i32, i32
  }
  func.func @transform_1(%arg0: i32, %arg1: i32) -> (i32, i32) {
    %c0_i32 = arith.constant 0 : i32
    return %arg0, %arg1 : i32, i32
  }
}

</mosaic_0001>

<bundles_post_ra>
// kernel: tpu_custom_call.1
= control target key start
LH: loop header
LB: loop body
LE: loop exit
PB: predicated region body
PF: predicated region fallthrough
CT: control target
= control target key end

     0   :  { %6 = vsyncpa [#allocation3], 0  ;;  %s104_s0 = inlined_call_operand.hbm [shape: f32[2,1024], index: 0, kind: input, shape index: {}]   ;;  %s105_s1 = inlined_call_operand.hbm [shape: f32[2,1024], index: 1, kind: output, shape index: {}]  }
   0x1   :  { %7 = vsyncpa [#allocation4], 0  ;;  %s86_s6 = smov [#allocation2]  }
   0x2   :  { %s14_s7 = sshll.u32 %s86_s6, 4  ;;  %s15_s7 = int_to_ptr.vmem [resolvable:$true] %s14_s7 }
   0x3   :  { %s50_s8 = scalar_lea.vmem %s15_s7, 256  ;;  %p55_p1 = scmp.lt.s32.totalorder %s15_s7, %s15_s7 }
   0x4   :  { %p51_p0 = scmp.ne.s32.totalorder %s15_s7, %s50_s8  ;;  %p56_p2 = scmp.lt.s32.totalorder %s50_s8, %s50_s8 }
   0x6   :  { %p57_p3 = por %p56_p2, %p55_p1 }
   0x8   :  { %p58_p4 = pnand %p57_p3, %p51_p0 }
   0xa   :  { %61 = shalt.err (!%p58_p4)
}
   0xb   :  { %17 = dma.hbm_to_vmem [thread:$0]  %s104_s0, 256, %s15_s7, [#allocation3]  }
   0xc   :  { %82 = dma.done.wait [#allocation3], 256  }
   0xd   :  { %83 = vsyncadd [#allocation3], 4294967040  ;;  %s87_s11 = smov [#allocation5]   ;;  %v21_v0 = vld [vmem:[#allocation2] sm:$0xff]  ;;  %v22_v1 = vld [vmem:[#allocation2 + $0x8] sm:$0xff] }
   0xe   :  { %s31_s12 = sshll.u32 %s87_s11, 4  ;;  %23 = vst [vmem:[#allocation5] sm:$0xff] %v21_v0  ;;  %24 = vst [vmem:[#allocation5 + $0x8] sm:$0xff] %v22_v1  ;;  %s32_s12 = int_to_ptr.vmem [resolvable:$true] %s31_s12 }
   0xf   :  { %s62_s13 = scalar_lea.vmem %s32_s12, 256  ;;  %p67_p6 = scmp.lt.s32.totalorder %s32_s12, %s32_s12 }
  0x10   :  { %p63_p5 = scmp.ne.s32.totalorder %s32_s12, %s62_s13  ;;  %p68_p7 = scmp.lt.s32.totalorder %s62_s13, %s62_s13 }
  0x12   :  { %p69_p8 = por %p68_p7, %p67_p6 }
  0x14   :  { %p70_p9 = pnand %p69_p8, %p63_p5 }
  0x16   :  { %73 = shalt.err (!%p70_p9)
}
  0x17   :  { %34 = dma.vmem_to_hbm [thread:$0]  %s32_s12, 256, %s105_s1, [#allocation4]  }
  0x18   :  { %84 = dma.done.wait [#allocation4], 256  }
  0x19   :  { %85 = vsyncadd [#allocation4], 4294967040 }
  0x1a   :  { %38 = vsyncpa [#allocation3], 1 }
  0x1b   :  { %39 = vsyncpa [#allocation4], 1 }

</bundles_post_ra>
